<compile_context>
chip_gen: v7x
topology: tpu7x:2x2x1
jax: 0.10.0
libtpu: 0.0.40
codegen_flags: <defaults>
</compile_context>

<pallas_src>
import jax
import jax.numpy as jnp
from jax.experimental import pallas as pl
from jax.experimental.pallas import tpu as pltpu

DCP_WINDOWS = (3, 7, 15, 31, 63, 127, 255)
NUM_WINDOWS = len(DCP_WINDOWS)
OMEGA = 0.9
_POS_INF = float("inf")   # Python scalar -> not a captured jnp constant


# --------------------------------------------------------------------------
# helpers
# --------------------------------------------------------------------------
def _round_up(x, m):
    return ((x + m - 1) // m) * m


def _vmem_capacity_bytes():
    try:
        cap = int(pltpu.get_tpu_info().vmem_capacity_bytes)
        if cap >= (8 << 20):
            return cap
    except Exception:
        pass
    return 64 << 20   # conservative: v7x physical VMEM per TensorCore


def _auto_filter_dtype():
    """bf16 storage for the DCP intermediate on bf16-VPU chips, else f32."""
    try:
        kind = jax.devices()[0].device_kind.lower()
    except Exception:
        return jnp.float32
    if any(tag in kind for tag in ("v6", "v7", "tpu7")):
        return jnp.bfloat16
    return jnp.float32


def _pick_tile(total, step, budget_bytes, bytes_per_unit):
    """Largest multiple of `step` dividing `total` fitting the VMEM budget."""
    for t in range(total, step - 1, -step):
        if total % t == 0 and t * bytes_per_unit <= budget_bytes:
            return t
    return step


def _clipped_min_step(cur, delta, axis, size, idx):
    """One clipped sliding-min step: out[i] = min(cur[i-d], cur[i], cur[i+d]),
    out-of-range neighbours (beyond [0, size)) dropped.  Valid whenever
    delta <= current_radius + 1, so it composes clipped box mins."""
    fwd = pltpu.roll(cur, shift=delta, axis=axis)          # out[i] = cur[i - d]
    bwd = pltpu.roll(cur, shift=size - delta, axis=axis)   # out[i] = cur[i + d]
    fwd = jnp.where(idx >= delta, fwd, _POS_INF)
    bwd = jnp.where(idx < size - delta, bwd, _POS_INF)
    return jnp.minimum(jnp.minimum(cur, fwd), bwd)


# --------------------------------------------------------------------------
# pass A: dark channel + H-axis (sublane) nested clipped sliding mins
# --------------------------------------------------------------------------
def _make_rowmin_kernel(H_pad, W_pad, TW, H_orig, W_orig, out_dtype):
    pad_h = H_pad != H_orig
    pad_w = W_pad != W_orig

    def kernel(i_ref, a_ref, o_ref):
        b = pl.program_id(0)

        inv_a = [1.0 / a_ref[b, c] for c in range(3)]
        dark = jnp.minimum(jnp.minimum(i_ref[0] * inv_a[0], i_ref[1] * inv_a[1]),
                           i_ref[2] * inv_a[2])

        row_idx = jax.lax.broadcasted_iota(jnp.int32, (H_pad, 1), 0)

        # Padded pixels -> +inf so the min filter is clipped at the ORIGINAL
        # image border (never wins a min for valid pixels).
        if pad_h or pad_w:
            valid = None
            if pad_h:
                valid = row_idx < H_orig
            if pad_w:
                col_idx = jax.lax.broadcasted_iota(jnp.int32, (1, TW), 1)
                col_ok = (col_idx + pl.program_id(1) * TW) < W_orig
                valid = col_ok if valid is None else jnp.logical_and(valid, col_ok)
            dark = jnp.where(valid, dark, _POS_INF)

        # Nested incremental clipped sliding min along H: window radii nest
        # (r_k = 2*r_{k-1}+1), so each window costs one roll-pair step.
        cur = dark
        prev_r = 0
        saturated = False
        for k, win in enumerate(DCP_WINDOWS):
            r = (win - 1) // 2
            if not saturated:
                if r >= H_pad - 1:          # window covers the whole axis
                    cur = jnp.broadcast_to(jnp.min(cur, axis=0, keepdims=True),
                                           (H_pad, TW))
                    saturated = True
                else:
                    cur = _clipped_min_step(cur, prev_r + 1, 0, H_pad, row_idx)
            prev_r = r
            o_ref[k] = cur.astype(out_dtype)

    return kernel


# --------------------------------------------------------------------------
# pass B: W-axis (lane) mins per window + per-pixel softmax / refine tail
# --------------------------------------------------------------------------
def _make_refine_kernel(TH, W_pad):
    def kernel(i_ref, s_ref, a_ref, wp_ref, bp_ref, wg_ref, bg_ref,
               wr_ref, br_ref, o_ref):
        b = pl.program_id(0)
        col_idx = jax.lax.broadcasted_iota(jnp.int32, (1, W_pad), 1)

        # x = I * 2 - 1
        x = [i_ref[c] * 2.0 - 1.0 for c in range(3)]

        # Online softmax over the window axis fused with the box-min loop:
        # only running (m, denom, num) stay live.
        m = denom = num = None
        for k, win in enumerate(DCP_WINDOWS):
            r = (win - 1) // 2
            cur = s_ref[k].astype(jnp.float32)   # H-axis min from pass A
            if r >= W_pad - 1:                   # window covers the whole row
                cur = jnp.broadcast_to(jnp.min(cur, axis=1, keepdims=True),
                                       (TH, W_pad))
            else:
                for j in range(k + 1):           # deltas 1, 2, 4, ..., 2**k
                    cur = _clipped_min_step(cur, 1 << j, 1, W_pad, col_idx)

            # pssnet stand-in: per-pixel 1x1 conv 3 -> NUM_WINDOWS (logit k)
            logit = (bp_ref[k] + wp_ref[k, 0] * x[0]
                     + wp_ref[k, 1] * x[1] + wp_ref[k, 2] * x[2])
            if k == 0:
                m, denom, num = logit, jnp.ones_like(logit), cur
            else:
                m_new = jnp.maximum(m, logit)
                scale = jnp.exp(m - m_new)
                e = jnp.exp(logit - m_new)
                denom = denom * scale + e
                num = num * scale + cur * e
                m = m_new

        dcp = num / denom                        # exact softmax-weighted DCP
        t = 1.0 - OMEGA * dcp
        tr_in = t * 2.0 - 1.0

        # gUNet_T stand-in: per-pixel 1x1 conv (4 -> 1) + tanh, clamp [0.1, 1]
        g = (bg_ref[0] + wg_ref[0] * x[0] + wg_ref[1] * x[1]
             + wg_ref[2] * x[2] + wg_ref[3] * tr_in)
        t_refine = jnp.clip(jnp.tanh(g), 0.1, 1.0)
        inv_t = pl.reciprocal(t_refine, approx=True)   # t_refine in [0.1, 1]

        # J_refine = (I - A) / t_refine + A ;  j_norm = J_refine * 2 - 1
        a = [a_ref[b, c] for c in range(3)]
        jn = [((i_ref[c] - a[c]) * inv_t + a[c]) * 2.0 - 1.0 for c in range(3)]

        # RefineNet stand-in: per-pixel 1x1 conv on concat(j_norm, i_norm)
        for co in range(3):
            acc = br_ref[co]
            for c in range(3):
                acc = acc + wr_ref[co, c] * jn[c]
            for c in range(3):
                acc = acc + wr_ref[co, 3 + c] * x[c]
            o_ref[co] = jnp.tanh(acc) * 0.5 + 0.5      # out * 0.5 + 0.5

    return kernel


# --------------------------------------------------------------------------
# wrapper
# --------------------------------------------------------------------------
def apsdcp_refine_forward(I, params, *, filter_dtype=None):
    I = jnp.asarray(I, jnp.float32)
    N, C, H, W = I.shape
    assert C == 3, "APSDCP_Refine expects RGB input"

    # ---- ANet stand-in (global pooling + tiny linear), plain-JAX glue ----
    x = I * 2.0 - 1.0
    feat = jnp.mean(x, axis=(2, 3))                        # (N, 3)
    A = jnp.tanh(feat @ params["Wa"].T + params["ba"])     # (N, 3)
    A = A * 0.5 + 0.5                                      # as in reference

    # ---- lane/sublane-dense padding: W -> mult of 128, H -> mult of 8 ----
    H_pad = _round_up(H, 8)
    W_pad = _round_up(W, 128)
    if (H_pad, W_pad) != (H, W):
        I_p = jnp.pad(I, ((0, 0), (0, 0), (0, H_pad - H), (0, W_pad - W)))
    else:
        I_p = I

    if filter_dtype is None:
        filter_dtype = _auto_filter_dtype()
    isz = jnp.dtype(filter_dtype).itemsize

    cap = _vmem_capacity_bytes()
    budget = max(int(0.45 * cap), 8 << 20)
    vmem_limit = int(0.9 * cap)                            # never exceed physical

    # per-unit VMEM estimates (double-buffered blocks + live f32 temporaries)
    per_col_a = H_pad * (2 * 3 * 4 + 2 * NUM_WINDOWS * isz + 10 * 4)
    per_row_b = W_pad * (2 * 3 * 4 + 2 * NUM_WINDOWS * isz + 2 * 3 * 4 + 16 * 4)
    TW = _pick_tile(W_pad, 128, budget, per_col_a)
    TH = _pick_tile(H_pad, 8, budget, per_row_b)

    smem = pl.BlockSpec(memory_space=pltpu.MemorySpace.SMEM)

    # ---- pass A: dark channel + H-axis (sublane) clipped sliding mins ----
    rowmin = pl.pallas_call(
        _make_rowmin_kernel(H_pad, W_pad, TW, H, W, filter_dtype),
        out_shape=jax.ShapeDtypeStruct((N, NUM_WINDOWS, H_pad, W_pad), filter_dtype),
        grid=(N, W_pad // TW),
        in_specs=[
            pl.BlockSpec((None, 3, H_pad, TW), lambda b, w: (b, 0, 0, w)),
            smem,                                              # A
        ],
        out_specs=pl.BlockSpec((None, NUM_WINDOWS, H_pad, TW),
                               lambda b, w: (b, 0, 0, w)),
        compiler_params=pltpu.CompilerParams(
            dimension_semantics=("parallel", "parallel"),
            vmem_limit_bytes=vmem_limit),
    )(I_p, A)

    # ---- pass B: W-axis (lane) mins + per-pixel softmax / refine tail ----
    out = pl.pallas_call(
        _make_refine_kernel(TH, W_pad),
        out_shape=jax.ShapeDtypeStruct((N, 3, H_pad, W_pad), jnp.float32),
        grid=(N, H_pad // TH),
        in_specs=[
            pl.BlockSpec((None, 3, TH, W_pad), lambda b, h: (b, 0, h, 0)),
            pl.BlockSpec((None, NUM_WINDOWS, TH, W_pad), lambda b, h: (b, 0, h, 0)),
            smem, smem, smem, smem, smem, smem, smem,          # A, Wp, bp, Wg, bg, Wr, br
        ],
        out_specs=pl.BlockSpec((None, 3, TH, W_pad), lambda b, h: (b, 0, h, 0)),
        compiler_params=pltpu.CompilerParams(
            dimension_semantics=("parallel", "parallel"),
            vmem_limit_bytes=vmem_limit),
    )(I_p, rowmin, A,
      params["Wp"], params["bp"], params["Wg"], params["bg"],
      params["Wr"], params["br"])

    if (H_pad, W_pad) != (H, W):
        out = out[:, :, :H, :W]
    return out


# --------------------------------------------------------------------------
# pure-JAX reference of the same stand-in forward (for a sanity check)
# --------------------------------------------------------------------------
def _reference_forward(I, params):
    I = I.astype(jnp.float32)
    x = I * 2.0 - 1.0
    feat = jnp.mean(x, axis=(2, 3))
    A = jnp.tanh(feat @ params["Wa"].T + params["ba"]) * 0.5 + 0.5   # (N,3)
    A4 = A[:, :, None, None]

    logits = (jnp.einsum("kc,nchw->nkhw", params["Wp"], x)
              + params["bp"][None, :, None, None])
    weights = jax.nn.softmax(logits, axis=1)

    dark = jnp.min(I / A4, axis=1, keepdims=True)                    # (N,1,H,W)
    dcps = [jax.lax.reduce_window(dark, jnp.inf, jax.lax.min,
                                  (1, 1, win, win), (1, 1, 1, 1), "SAME")
            for win in DCP_WINDOWS]
    dcp = jnp.sum(jnp.concatenate(dcps, axis=1) * weights, axis=1, keepdims=True)

    t = 1.0 - OMEGA * dcp
    tr_in = t * 2.0 - 1.0
    g = (jnp.einsum("c,nchw->nhw", params["Wg"][:3], x)[:, None]
         + params["Wg"][3] * tr_in + params["bg"][0])
    t_refine = jnp.clip(jnp.tanh(g), 0.1, 1.0)

    Jr = (I - A4) / t_refine + A4
    cat = jnp.concatenate([Jr * 2.0 - 1.0, x], axis=1)               # (N,6,H,W)
    out = (jnp.einsum("oc,nchw->nohw", params["Wr"], cat)
           + params["br"][None, :, None, None])
    return jnp.tanh(out) * 0.5 + 0.5


if __name__ == "__main__":
    key = jax.random.PRNGKey(0)
    ks = jax.random.split(key, 8)
    params = {
        "Wa": 0.5 * jax.random.normal(ks[0], (3, 3), jnp.float32),
        "ba": jnp.zeros((3,), jnp.float32),
        "Wp": 0.5 * jax.random.normal(ks[1], (NUM_WINDOWS, 3), jnp.float32),
        "bp": 0.1 * jax.random.normal(ks[2], (NUM_WINDOWS,), jnp.float32),
        "Wg": 0.5 * jax.random.normal(ks[3], (4,), jnp.float32),
        "bg": 0.1 * jax.random.normal(ks[4], (1,), jnp.float32),
        "Wr": 0.5 * jax.random.normal(ks[5], (3, 6), jnp.float32),
        "br": 0.1 * jax.random.normal(ks[6], (3,), jnp.float32),
    }
    I = jax.random.uniform(ks[7], (2, 3, 16, 16), dtype=jnp.float32)

    # f32 filter storage in the demo so the reference comparison is tight;
    # on v6e/v7x the default (auto) enables bf16 storage for the intermediate.
    out = apsdcp_refine_forward(I, params, filter_dtype=jnp.float32)
    out = jax.block_until_ready(out)

    assert out.shape == (2, 3, 16, 16)
    assert bool(jnp.all(jnp.isfinite(out)))

    ref = _reference_forward(I, params)
    max_err = float(jnp.max(jnp.abs(out - ref)))
    assert max_err < 5e-2, f"kernel/reference mismatch: {max_err}"

    print("KERNEL_OK")
</pallas_src>

<mosaic_0001>
module attributes {stable_mosaic.version = 11 : i64} {
  func.func @kernel(%arg0: i32, %arg1: i32, %arg2: memref<1x3x16x128xf32, #tpu.memory_space<vmem>>, %arg3: memref<2x3xf32, #tpu.memory_space<smem>>, %arg4: memref<1x7x16x128xf32, #tpu.memory_space<vmem>>) attributes {dimension_semantics = [#tpu.dimension_semantics<parallel>, #tpu.dimension_semantics<parallel>], iteration_bounds = array<i64: 2, 1>, scalar_prefetch = 0 : i64, scratch_operands = 0 : i64, tpu.core_type = #tpu.core_type<tc>, window_params = [{transform_indices = @transform_0, window_bounds = array<i64: 1, 3, 16, 128>}, {transform_indices = @transform_1, window_bounds = array<i64: 2, 3>}, {transform_indices = @transform_2, window_bounds = array<i64: 1, 7, 16, 128>}]} {
    %0 = arith.index_cast %arg0 : i32 to index
    %c0 = arith.constant 0 : index
    %1 = memref.load %arg3[%0, %c0] : memref<2x3xf32, #tpu.memory_space<smem>>
    %cst = arith.constant 1.000000e+00 : f32
    %2 = arith.divf %cst, %1 : f32
    %3 = arith.index_cast %arg0 : i32 to index
    %c1 = arith.constant 1 : index
    %4 = memref.load %arg3[%3, %c1] : memref<2x3xf32, #tpu.memory_space<smem>>
    %cst_0 = arith.constant 1.000000e+00 : f32
    %5 = arith.divf %cst_0, %4 : f32
    %6 = arith.index_cast %arg0 : i32 to index
    %c2 = arith.constant 2 : index
    %7 = memref.load %arg3[%6, %c2] : memref<2x3xf32, #tpu.memory_space<smem>>
    %cst_1 = arith.constant 1.000000e+00 : f32
    %8 = arith.divf %cst_1, %7 : f32
    %c0_2 = arith.constant 0 : index
    %c0_3 = arith.constant 0 : index
    %c0_4 = arith.constant 0 : index
    %c0_5 = arith.constant 0 : index
    %9 = vector.load %arg2[%c0_2, %c0_3, %c0_4, %c0_5] : memref<1x3x16x128xf32, #tpu.memory_space<vmem>>, vector<1x1x16x128xf32>
    %10 = vector.shape_cast %9 : vector<1x1x16x128xf32> to vector<16x128xf32>
    %11 = vector.broadcast %2 : f32 to vector<16x128xf32>
    %12 = arith.mulf %10, %11 : vector<16x128xf32>
    %c0_6 = arith.constant 0 : index
    %c1_7 = arith.constant 1 : index
    %c0_8 = arith.constant 0 : index
    %c0_9 = arith.constant 0 : index
    %13 = vector.load %arg2[%c0_6, %c1_7, %c0_8, %c0_9] : memref<1x3x16x128xf32, #tpu.memory_space<vmem>>, vector<1x1x16x128xf32>
    %14 = vector.shape_cast %13 : vector<1x1x16x128xf32> to vector<16x128xf32>
    %15 = vector.broadcast %5 : f32 to vector<16x128xf32>
    %16 = arith.mulf %14, %15 : vector<16x128xf32>
    %17 = arith.minimumf %12, %16 : vector<16x128xf32>
    %c0_10 = arith.constant 0 : index
    %c2_11 = arith.constant 2 : index
    %c0_12 = arith.constant 0 : index
    %c0_13 = arith.constant 0 : index
    %18 = vector.load %arg2[%c0_10, %c2_11, %c0_12, %c0_13] : memref<1x3x16x128xf32, #tpu.memory_space<vmem>>, vector<1x1x16x128xf32>
    %19 = vector.shape_cast %18 : vector<1x1x16x128xf32> to vector<16x128xf32>
    %20 = vector.broadcast %8 : f32 to vector<16x128xf32>
    %21 = arith.mulf %19, %20 : vector<16x128xf32>
    %22 = arith.minimumf %17, %21 : vector<16x128xf32>
    %23 = tpu.iota {dimensions = array<i32: 0>} : vector<16x1xi32>
    %24 = tpu.iota {dimensions = array<i32: 1>} : vector<1x128xi32>
    %c128_i32 = arith.constant 128 : i32
    %25 = arith.muli %arg1, %c128_i32 : i32
    %26 = vector.broadcast %25 : i32 to vector<1x128xi32>
    %27 = arith.addi %24, %26 : vector<1x128xi32>
    %c16_i32 = arith.constant 16 : i32
    %28 = vector.broadcast %c16_i32 : i32 to vector<1x128xi32>
    %29 = arith.cmpi slt, %27, %28 : vector<1x128xi32>
    %cst_14 = arith.constant 0x7F800000 : f32
    %30 = vector.shape_cast %29 : vector<1x128xi1> to vector<1x128xi1>
    %31 = vector.broadcast %30 : vector<1x128xi1> to vector<16x128xi1>
    %32 = vector.broadcast %cst_14 : f32 to vector<16x128xf32>
    %33 = arith.select %31, %22, %32 : vector<16x128xi1>, vector<16x128xf32>
    %c1_i32 = arith.constant 1 : i32
    %34 = tpu.dynamic_rotate %33 by %c1_i32 dim 0 : vector<16x128xf32>, i32 -> vector<16x128xf32>
    %c15_i32 = arith.constant 15 : i32
    %35 = tpu.dynamic_rotate %33 by %c15_i32 dim 0 : vector<16x128xf32>, i32 -> vector<16x128xf32>
    %c1_i32_15 = arith.constant 1 : i32
    %36 = vector.broadcast %c1_i32_15 : i32 to vector<16x1xi32>
    %37 = arith.cmpi sge, %23, %36 : vector<16x1xi32>
    %cst_16 = arith.constant 0x7F800000 : f32
    %38 = vector.shape_cast %37 : vector<16x1xi1> to vector<16x1xi1>
    %39 = vector.broadcast %38 : vector<16x1xi1> to vector<16x128xi1>
    %40 = vector.broadcast %cst_16 : f32 to vector<16x128xf32>
    %41 = arith.select %39, %34, %40 : vector<16x128xi1>, vector<16x128xf32>
    %c15_i32_17 = arith.constant 15 : i32
    %42 = vector.broadcast %c15_i32_17 : i32 to vector<16x1xi32>
    %43 = arith.cmpi slt, %23, %42 : vector<16x1xi32>
    %cst_18 = arith.constant 0x7F800000 : f32
    %44 = vector.shape_cast %43 : vector<16x1xi1> to vector<16x1xi1>
    %45 = vector.broadcast %44 : vector<16x1xi1> to vector<16x128xi1>
    %46 = vector.broadcast %cst_18 : f32 to vector<16x128xf32>
    %47 = arith.select %45, %35, %46 : vector<16x128xi1>, vector<16x128xf32>
    %48 = arith.minimumf %33, %41 : vector<16x128xf32>
    %49 = arith.minimumf %48, %47 : vector<16x128xf32>
    %c0_19 = arith.constant 0 : index
    %c0_20 = arith.constant 0 : index
    %c0_21 = arith.constant 0 : index
    %c0_22 = arith.constant 0 : index
    %50 = vector.load %arg4[%c0_19, %c0_20, %c0_21, %c0_22] : memref<1x7x16x128xf32, #tpu.memory_space<vmem>>, vector<1x1x16x128xf32>
    %51 = vector.shape_cast %50 : vector<1x1x16x128xf32> to vector<16x128xf32>
    %52 = vector.shape_cast %49 : vector<16x128xf32> to vector<1x1x16x128xf32>
    tpu.vector_store %arg4[%c0_19, %c0_20, %c0_21, %c0_22], %52 {strides = array<i32>} : memref<1x7x16x128xf32, #tpu.memory_space<vmem>>, vector<1x1x16x128xf32>,
    %c2_i32 = arith.constant 2 : i32
    %53 = tpu.dynamic_rotate %49 by %c2_i32 dim 0 : vector<16x128xf32>, i32 -> vector<16x128xf32>
    %c14_i32 = arith.constant 14 : i32
    %54 = tpu.dynamic_rotate %49 by %c14_i32 dim 0 : vector<16x128xf32>, i32 -> vector<16x128xf32>
    %c2_i32_23 = arith.constant 2 : i32
    %55 = vector.broadcast %c2_i32_23 : i32 to vector<16x1xi32>
    %56 = arith.cmpi sge, %23, %55 : vector<16x1xi32>
    %cst_24 = arith.constant 0x7F800000 : f32
    %57 = vector.shape_cast %56 : vector<16x1xi1> to vector<16x1xi1>
    %58 = vector.broadcast %57 : vector<16x1xi1> to vector<16x128xi1>
    %59 = vector.broadcast %cst_24 : f32 to vector<16x128xf32>
    %60 = arith.select %58, %53, %59 : vector<16x128xi1>, vector<16x128xf32>
    %c14_i32_25 = arith.constant 14 : i32
    %61 = vector.broadcast %c14_i32_25 : i32 to vector<16x1xi32>
    %62 = arith.cmpi slt, %23, %61 : vector<16x1xi32>
    %cst_26 = arith.constant 0x7F800000 : f32
    %63 = vector.shape_cast %62 : vector<16x1xi1> to vector<16x1xi1>
    %64 = vector.broadcast %63 : vector<16x1xi1> to vector<16x128xi1>
    %65 = vector.broadcast %cst_26 : f32 to vector<16x128xf32>
    %66 = arith.select %64, %54, %65 : vector<16x128xi1>, vector<16x128xf32>
    %67 = arith.minimumf %49, %60 : vector<16x128xf32>
    %68 = arith.minimumf %67, %66 : vector<16x128xf32>
    %c0_27 = arith.constant 0 : index
    %c1_28 = arith.constant 1 : index
    %c0_29 = arith.constant 0 : index
    %c0_30 = arith.constant 0 : index
    %69 = vector.load %arg4[%c0_27, %c1_28, %c0_29, %c0_30] : memref<1x7x16x128xf32, #tpu.memory_space<vmem>>, vector<1x1x16x128xf32>
    %70 = vector.shape_cast %69 : vector<1x1x16x128xf32> to vector<16x128xf32>
    %71 = vector.shape_cast %68 : vector<16x128xf32> to vector<1x1x16x128xf32>
    tpu.vector_store %arg4[%c0_27, %c1_28, %c0_29, %c0_30], %71 {strides = array<i32>} : memref<1x7x16x128xf32, #tpu.memory_space<vmem>>, vector<1x1x16x128xf32>,
    %c4_i32 = arith.constant 4 : i32
    %72 = tpu.dynamic_rotate %68 by %c4_i32 dim 0 : vector<16x128xf32>, i32 -> vector<16x128xf32>
    %c12_i32 = arith.constant 12 : i32
    %73 = tpu.dynamic_rotate %68 by %c12_i32 dim 0 : vector<16x128xf32>, i32 -> vector<16x128xf32>
    %c4_i32_31 = arith.constant 4 : i32
    %74 = vector.broadcast %c4_i32_31 : i32 to vector<16x1xi32>
    %75 = arith.cmpi sge, %23, %74 : vector<16x1xi32>
    %cst_32 = arith.constant 0x7F800000 : f32
    %76 = vector.shape_cast %75 : vector<16x1xi1> to vector<16x1xi1>
    %77 = vector.broadcast %76 : vector<16x1xi1> to vector<16x128xi1>
    %78 = vector.broadcast %cst_32 : f32 to vector<16x128xf32>
    %79 = arith.select %77, %72, %78 : vector<16x128xi1>, vector<16x128xf32>
    %c12_i32_33 = arith.constant 12 : i32
    %80 = vector.broadcast %c12_i32_33 : i32 to vector<16x1xi32>
    %81 = arith.cmpi slt, %23, %80 : vector<16x1xi32>
    %cst_34 = arith.constant 0x7F800000 : f32
    %82 = vector.shape_cast %81 : vector<16x1xi1> to vector<16x1xi1>
    %83 = vector.broadcast %82 : vector<16x1xi1> to vector<16x128xi1>
    %84 = vector.broadcast %cst_34 : f32 to vector<16x128xf32>
    %85 = arith.select %83, %73, %84 : vector<16x128xi1>, vector<16x128xf32>
    %86 = arith.minimumf %68, %79 : vector<16x128xf32>
    %87 = arith.minimumf %86, %85 : vector<16x128xf32>
    %c0_35 = arith.constant 0 : index
    %c2_36 = arith.constant 2 : index
    %c0_37 = arith.constant 0 : index
    %c0_38 = arith.constant 0 : index
    %88 = vector.load %arg4[%c0_35, %c2_36, %c0_37, %c0_38] : memref<1x7x16x128xf32, #tpu.memory_space<vmem>>, vector<1x1x16x128xf32>
    %89 = vector.shape_cast %88 : vector<1x1x16x128xf32> to vector<16x128xf32>
    %90 = vector.shape_cast %87 : vector<16x128xf32> to vector<1x1x16x128xf32>
    tpu.vector_store %arg4[%c0_35, %c2_36, %c0_37, %c0_38], %90 {strides = array<i32>} : memref<1x7x16x128xf32, #tpu.memory_space<vmem>>, vector<1x1x16x128xf32>,
    %cst_39 = arith.constant dense<0x7F800000> : vector<128xf32>
    %91 = vector.multi_reduction <minimumf>, %87, %cst_39 [0] : vector<16x128xf32> to vector<128xf32>
    %92 = vector.shape_cast %91 : vector<128xf32> to vector<1x128xf32>
    %93 = vector.shape_cast %92 : vector<1x128xf32> to vector<1x128xf32>
    %94 = vector.broadcast %93 : vector<1x128xf32> to vector<16x128xf32>
    %c0_40 = arith.constant 0 : index
    %c3 = arith.constant 3 : index
    %c0_41 = arith.constant 0 : index
    %c0_42 = arith.constant 0 : index
    %95 = vector.load %arg4[%c0_40, %c3, %c0_41, %c0_42] : memref<1x7x16x128xf32, #tpu.memory_space<vmem>>, vector<1x1x16x128xf32>
    %96 = vector.shape_cast %95 : vector<1x1x16x128xf32> to vector<16x128xf32>
    %97 = vector.shape_cast %94 : vector<16x128xf32> to vector<1x1x16x128xf32>
    tpu.vector_store %arg4[%c0_40, %c3, %c0_41, %c0_42], %97 {strides = array<i32>} : memref<1x7x16x128xf32, #tpu.memory_space<vmem>>, vector<1x1x16x128xf32>,
    %c0_43 = arith.constant 0 : index
    %c4 = arith.constant 4 : index
    %c0_44 = arith.constant 0 : index
    %c0_45 = arith.constant 0 : index
    %98 = vector.load %arg4[%c0_43, %c4, %c0_44, %c0_45] : memref<1x7x16x128xf32, #tpu.memory_space<vmem>>, vector<1x1x16x128xf32>
    %99 = vector.shape_cast %98 : vector<1x1x16x128xf32> to vector<16x128xf32>
    %100 = vector.shape_cast %94 : vector<16x128xf32> to vector<1x1x16x128xf32>
    tpu.vector_store %arg4[%c0_43, %c4, %c0_44, %c0_45], %100 {strides = array<i32>} : memref<1x7x16x128xf32, #tpu.memory_space<vmem>>, vector<1x1x16x128xf32>,
    %c0_46 = arith.constant 0 : index
    %c5 = arith.constant 5 : index
    %c0_47 = arith.constant 0 : index
    %c0_48 = arith.constant 0 : index
    %101 = vector.load %arg4[%c0_46, %c5, %c0_47, %c0_48] : memref<1x7x16x128xf32, #tpu.memory_space<vmem>>, vector<1x1x16x128xf32>
    %102 = vector.shape_cast %101 : vector<1x1x16x128xf32> to vector<16x128xf32>
    %103 = vector.shape_cast %94 : vector<16x128xf32> to vector<1x1x16x128xf32>
    tpu.vector_store %arg4[%c0_46, %c5, %c0_47, %c0_48], %103 {strides = array<i32>} : memref<1x7x16x128xf32, #tpu.memory_space<vmem>>, vector<1x1x16x128xf32>,
    %c0_49 = arith.constant 0 : index
    %c6 = arith.constant 6 : index
    %c0_50 = arith.constant 0 : index
    %c0_51 = arith.constant 0 : index
    %104 = vector.load %arg4[%c0_49, %c6, %c0_50, %c0_51] : memref<1x7x16x128xf32, #tpu.memory_space<vmem>>, vector<1x1x16x128xf32>
    %105 = vector.shape_cast %104 : vector<1x1x16x128xf32> to vector<16x128xf32>
    %106 = vector.shape_cast %94 : vector<16x128xf32> to vector<1x1x16x128xf32>
    tpu.vector_store %arg4[%c0_49, %c6, %c0_50, %c0_51], %106 {strides = array<i32>} : memref<1x7x16x128xf32, #tpu.memory_space<vmem>>, vector<1x1x16x128xf32>,
    return
  }
  func.func @transform_0(%arg0: i32, %arg1: i32) -> (i32, i32, i32, i32) {
    %c0_i32 = arith.constant 0 : i32
    %c0_i32_0 = arith.constant 0 : i32
    %c0_i32_1 = arith.constant 0 : i32
    return %arg0, %c0_i32, %c0_i32_0, %arg1 : i32, i32, i32, i32
  }
  func.func @transform_1(%arg0: i32, %arg1: i32) -> (i32, i32) {
    %c0_i32 = arith.constant 0 : i32
    %c0_i32_0 = arith.constant 0 : i32
    %c0_i32_1 = arith.constant 0 : i32
    return %c0_i32, %c0_i32_0 : i32, i32
  }
  func.func @transform_2(%arg0: i32, %arg1: i32) -> (i32, i32, i32, i32) {
    %c0_i32 = arith.constant 0 : i32
    %c0_i32_0 = arith.constant 0 : i32
    %c0_i32_1 = arith.constant 0 : i32
    return %arg0, %c0_i32, %c0_i32_0, %arg1 : i32, i32, i32, i32
  }
}

</mosaic_0001>

<bundles_post_ra>
// kernel: tpu_custom_call.1
= control target key start
LH: loop header
LB: loop body
LE: loop exit
PB: predicated region body
PF: predicated region fallthrough
CT: control target
= control target key end

     0   :  { %7 = vsyncpa [#allocation3], 0  ;;  %s997_s0 = inlined_call_operand.hbm [shape: f32[2,3,16,128], index: 0, kind: input, shape index: {}]   ;;  %s998_s1 = inlined_call_operand.vmem [shape: f32[2,3], index: 1, kind: input, shape index: {}]   ;;  %s999_s2 = inlined_call_operand.hbm [shape: f32[2,7,16,128], index: 2, kind: output, shape index: {}]  }
   0x1   :  { %9 = vsyncpa [#allocation3 + $0x1], 0 }
   0x2   :  { %10 = vsyncpa [#allocation5], 0 }
   0x3   :  { %11 = vsyncpa [#allocation4], 0 }
   0x4   :  { %13 = vsyncpa [#allocation4 + $0x1], 0  ;;  %s743_s9 = smov 0   ;;  %s745_s10 = smov 0  }
   0x5   :  { %s747_s11 = smov 0   ;;  %s749_s12 = smov 0  }
   0x6   :  { %s751_s13 = smov 0   ;;  %s753_s14 = smov 0  }
   0x7 LB: > { %s466_s15 = sadd.s32 4294967295, %s719_s14   ;;  %s467_s16 = sadd.s32 4294967294, %s719_s14   ;;  %s719_s14 = sphi %s753_s14, %s19_s14   ;;  %s715_s13 = sphi %s751_s13, %s1022_s13   ;;  %s711_s12 = sphi %s749_s12, %s1021_s12   ;;  %s707_s11 = sphi %s747_s11, %s1020_s11   ;;  %s703_s10 = sphi %s745_s10, %s1019_s10   ;;  %s699_s9 = sphi %s743_s9, %s1018_s9  }
   0x8   : > { %s40_s17 = sadd.s32 1, %s707_s11  ;;  %p47_p0 = scmp.ne.s32.totalorder %s707_s11, %s703_s10 }
   0x9   : > { %p48_p1 = scmp.eq.s32.totalorder %s719_s14, 0  ;;  %p53_p2 = scmp.ne.s32.totalorder %s703_s10, %s699_s9 }
   0xa   : > { %p781_p3 = scmp.eq.s32.totalorder %s466_s15, 0  ;;  %p100_p4 = scmp.eq.s32.totalorder %s466_s15, 1 }
   0xb   : > { %p785_p5 = por %p48_p1, %p47_p0  ;;  %p106_p6 = scmp.eq.s32.totalorder %s467_s16, 1 }
   0xc   : > { %s1004_s18 = scalar_select %p781_p3, 1, 0 }
   0xd   : > { %p791_p7 = por %p781_p3, %p53_p2  ;;  %p795_p8 = por %p100_p4, %p47_p0 }
   0xe   : > { %p799_p9 = por %p106_p6, %p53_p2  ;;  %p468_p10 = scmp.ge.s32.totalorder %s719_s14, 1 }
   0xf   : > { %s1006_s20 = scalar_select %p791_p7, 1, 0 }
  0x10   : > { %s1007_s21 = scalar_select %p795_p8, 1, 0 }
  0x11   : > { %s1008_s22 = scalar_select %p799_p9, 1, 0 }
  0x12   : > { %p113_p11 = scmp.lt.s32.totalorder %s719_s14, 3  ;;  %s126_s25 = sshll.u32 %s998_s1, 4  ;;  %s127_s25 = int_to_ptr.vmem [resolvable:$true] %s126_s25 }
  0x13   : > { %p526_p0 = scmp.lt.s32.totalorder %s719_s14, 2  ;;  %s31_s29 = sadd.s32 1, %s715_s13 }
  0x14   : > { %p808_p12 = pnand %p468_p10, %p113_p11  ;;  %p829_p6 = scmp.ge.s32.totalorder %s31_s29, 2 }
  0x15   : > { %p818_p2 = pnand %p526_p0, %p785_p5  ;;  %s137_s3 = sand.u32 1, %s707_s11  }
  0x16   : > { %p513_p1 = pneg %p808_p12  ;;  %s588_s4 = scalar_lea.vmem %s127_s25, 32 }
  0x17   : > { %p589_p10 = scmp.ne.s32.totalorder %s127_s25, %s588_s4  ;;  %p596_p13 = scmp.lt.s32.totalorder %s127_s25, %s127_s25 }
  0x18   : > { %p824_p4 = pnand %p513_p1, %p781_p3  ;;  %p597_p9 = scmp.lt.s32.totalorder %s588_s4, %s588_s4 }
  0x1a   : > { %p590_p11 = pneg %p824_p4  ;;  %p598_p8 = por %p597_p9, %p596_p13 }
  0x1c   : > { %p591_p5 = pnand %p590_p11, %p589_p10 }
  0x1e   : > { %p592_p0 = pneg %p591_p5 }
  0x20   : > { %p599_p1 = pnand %p598_p8, %p592_p0 }
  0x22   : > { %602 = shalt.err (!%p599_p1)
}
  0x23   : > { %s721_s5 = smov [#allocation6]   ;;  %s1024_s29 = smov (%p829_p6, %s31_s29), 0 }
  0x24   : > { %516 = dma.vmem_to_smem (!%p824_p4), %s127_s25, 32, %s721_s5, [#allocation5]  }
  0x25   : > { %s494_s6 = smul.u32 48, %s137_s3  ;;  %s35_s7 = ssub.s32 %s715_s13, %s1024_s29 }
  0x26   : > { %s495_s8 = smul.u32 768, %s715_s13  ;;  %p38_p8 = scmp.eq.s32.totalorder %s35_s7, 0 }
  0x27   : > { %s141_s23 = scalar_lea.vmem [#allocation2], %s494_s6  ;;  %s857_s28 = scalar_lea.sflag [#allocation3], %s137_s3 }
  0x28   : > { %s848_s19 = scalar_lea.hbm %s997_s0, %s495_s8  ;;  %s149_s24 = sshll.u32 %s141_s23, 4  ;;  %s855_s24 = int_to_ptr.vmem [resolvable:$true] %s149_s24 }
  0x29   : > { %s853_s25 = scalar_select %p38_p8, %s707_s11, %s40_s17  }
  0x2a   : > { %s603_s30 = scalar_lea.hbm %s848_s19, 768  ;;  %p605_p13 = pneg %p818_p2 }
  0x2b   : > { %p604_p9 = scmp.ne.s32.totalorder %s848_s19, %s603_s30  ;;  %s608_s6 = scalar_lea.hbm %s997_s0, 1536 }
  0x2c   : > { %p609_p10 = scmp.lt.u32.totalorder %s848_s19, %s997_s0  ;;  %p610_p11 = scmp.lt.u32.totalorder %s608_s6, %s603_s30 }
  0x2d   : > { %p606_p4 = pnand %p605_p13, %p604_p9  ;;  %p612_p0 = scmp.lt.u32.totalorder %s603_s30, %s848_s19 }
  0x2e   : > { %p611_p5 = por %p610_p11, %p609_p10 }
  0x2f   : > { %p607_p6 = pneg %p606_p4 }
  0x30   : > { %p613_p1 = por %p612_p0, %p611_p5 }
  0x32   : > { %p614_p8 = pnand %p613_p1, %p607_p6 }
  0x34   : > { %617 = shalt.err (!%p614_p8)
}
  0x35   : > { %s618_s17 = scalar_lea.vmem %s855_s24, 768  ;;  %s722_s3 = smov [#allocation2]  }
  0x36   : > { %p619_p9 = scmp.ne.s32.totalorder %s855_s24, %s618_s17  ;;  %s623_s15 = sshll.u32 %s722_s3, 4  ;;  %s624_s15 = int_to_ptr.vmem [resolvable:$false] %s623_s15 }
  0x37   : > { %s625_s16 = scalar_lea.vmem %s624_s15, 1536  ;;  %p626_p7 = scmp.lt.s32.totalorder %s855_s24, %s624_s15 }
  0x38   : > { %p621_p4 = pnand %p619_p9, %p605_p13  ;;  %p627_p10 = scmp.lt.s32.totalorder %s625_s16, %s618_s17 }
  0x3a   : > { %p622_p3 = pneg %p621_p4  ;;  %p628_p11 = por %p627_p10, %p626_p7 }
  0x3c   : > { %p629_p5 = pnand %p628_p11, %p622_p3 }
  0x3e   : > { %632 = shalt.err (!%p629_p5)
}
  0x3f   : > { %s723_s23 = smov 128   ;;  %s724_s30 = smov 8  }
  0x40   : > { %520 = dma.hbm_to_vmem [thread:$0]  (!%p818_p2), %s848_s19, 768, %s855_s24, %s857_s28, %s723_s23, %s723_s23, %s724_s30  }
  0x41   : > { %161 = sbr.rel (%p808_p12) target bundleno = 212 (0xd4), region = 28  ;;  %s888_s4 = sand.u32 (!%p808_p12), 1, %s703_s10  }
  0x42   : > { %s496_s5 = smul.u32 (!%p808_p12), 48, %s888_s4  ;;  %s164_s6 = scalar_lea.sflag (!%p808_p12), [#allocation3], %s888_s4 }
  0x43   : > { %p1013_p3 = scmp.ne.s32.totalorder (!%p808_p12), %s1006_s20, 0 }
  0x44   : > { %s892_s7 = scalar_lea.vmem (!%p808_p12), [#allocation2], %s496_s5 }
  0x48   : > { %686 = dma.done.wait (%p1013_p3), %s164_s6, 768  }
  0x49   : > { %688 = vsyncadd (%p1013_p3), %s164_s6, 4294966528  ;;  %p1014_p7 = scmp.ne.s32.totalorder %s1004_s18, 0 }
  0x4b   : > { %690 = dma.done.wait (%p1014_p7), [#allocation5], 32  }
  0x4c   : > { %692 = vsyncadd (%p1014_p7), [#allocation5], 4294967264 }
  0x4d   : > { %176 = sfence }
  0x4e   : > { %s474_s26 = sshll.u32 %s711_s12, 7  ;;  %v229_v6 = vlaneseq  ;;  %v208_v7 = vld [vmem:[%s892_s7] sm:$0xff]  ;;  %v209_v8 = vld [vmem:[%s892_s7 + $0x8] sm:$0xff]  ;;  %v475_v9 = vld [vmem:[%s892_s7 + $0x10] sm:$0xff]  ;;  %s497_s3 = smul.u32 112, %s888_s4 }
  0x4f   : > { %s194_s27 = sld [smem:[#allocation6 + %s474_s26]]  ;;  %s198_s19 = sadd.s32 1, %s474_s26  ;;  %v476_v10 = vld [vmem:[%s892_s7 + $0x18] sm:$0xff]  ;;  %v477_v12 = vld [vmem:[%s892_s7 + $0x20] sm:$0xff]  ;;  %v478_v13 = vld [vmem:[%s892_s7 + $0x28] sm:$0xff] }
  0x50   : > { %s199_s24 = sld [smem:[#allocation6 + %s198_s19]]  ;;  %s203_s28 = sadd.s32 2, %s474_s26  ;;  %v909_v14 = vshrl.u32 %v229_v6, 7  ;;  %v233_v18 = vand.u32 127, %v229_v6 }
  0x51   : > { %s204_s8 = sld [smem:[#allocation6 + %s203_s28]]  ;;  %s920_s15 = scalar_lea.vmem [#allocation7], %s497_s3 }
  0x52   : > { %v231_v26 = vadd.s32 8, %v909_v14  ;;  %vm237_vm0 = vcmp.lt.s32.totalorder %v233_v18, 16  ;;  %vm244_vm1 = vcmp.lt.s32.totalorder %v909_v14, 1  ;;  %vm249_vm2 = vcmp.lt.s32.totalorder %v909_v14, 7  ;;  %s504_s16 = smul.u32 1792, %s711_s12  ;;  %s369_s23 = sshll.u32 %s920_s15, 4  ;;  %s940_s23 = int_to_ptr.vmem [resolvable:$true] %s369_s23 }
  0x53   : > { %vm252_vm3 = vcmp.ge.s32.totalorder %v909_v14, 1  ;;  %vm276_vm5 = vcmp.lt.s32.totalorder %v909_v14, 2  ;;  %vm281_vm6 = vcmp.lt.s32.totalorder %v909_v14, 6  ;;  %vm284_vm7 = vcmp.ge.s32.totalorder %v909_v14, 2  ;;  %s355_s12 = scalar_lea.sflag [#allocation4], %s888_s4  ;;  %s633_s7 = scalar_lea.vmem %s940_s23, 1792 }
  0x54   : > { %vm261_vm4 = vcmp.lt.s32.totalorder %v231_v26, 15  ;;  %vm293_vm8 = vcmp.lt.s32.totalorder %v231_v26, 14  ;;  %vm309_vm9 = vcmp.lt.s32.totalorder %v909_v14, 4  ;;  %vm312_vm10 = vcmp.ge.s32.totalorder %v909_v14, 4  ;;  %s938_s6 = scalar_lea.hbm %s999_s2, %s504_s16  ;;  %p634_p12 = scmp.ne.s32.totalorder %s940_s23, %s633_s7 }
  0x55   : > { %v195_v0 = vstv %s194_s27  ;;  %vm321_vm11 = vcmp.lt.s32.totalorder %v231_v26, 12  ;;  %p1015_p2 = scmp.ne.s32.totalorder %s1007_s21, 0  ;;  %s725_s26 = smov [#allocation7]  }
  0x56   : > { %582 = vrcp.f32 %v195_v0  ;;  %v200_v1 = vstv %s199_s24  ;;  %s637_s27 = sshll.u32 %s725_s26, 4  ;;  %s638_s27 = int_to_ptr.vmem [resolvable:$false] %s637_s27 }
  0x57   : > { %v205_v2 = vstv %s204_s8  ;;  %584 = vrcp.f32 %v200_v1  ;;  %p635_p13 = pnand %p634_p12, %p1015_p2  ;;  %s639_s19 = scalar_lea.vmem %s638_s27, 3584 }
  0x58   : > { %586 = vrcp.f32 %v205_v2  ;;  %p640_p0 = scmp.lt.s32.totalorder %s940_s23, %s638_s27  ;;  %p641_p1 = scmp.lt.s32.totalorder %s639_s19, %s633_s7 }
  0x59   : > { %p636_p6 = pneg %p635_p13 }
  0x5a   : > { %p642_p8 = por %p641_p1, %p640_p0 }
  0x5c   : > { %p643_p9 = pnand %p642_p8, %p636_p6 }
  0x60   : > { %v583_v3 = vpop.eup %582 }
  0x61   : > { %v585_v4 = vpop.eup %584  ;;  %498 = vpush %v583_v3 }
  0x62   : > { %v587_v5 = vpop.eup %586  ;;  %500 = vpush %v585_v4 }
  0x63   : > { %502 = vpush %v587_v5 }
  0x92   : > { %s499_s18 = spop %498 }
  0x93   : > { %v210_v11 = vstv %s499_s18  ;;  %s501_s20 = spop %500 }
  0x94   : > { %v211_v15 = vmul.f32 %v210_v11, %v208_v7  ;;  %v212_v16 = vmul.f32 %v210_v11, %v209_v8  ;;  %v216_v17 = vstv %s501_s20  ;;  %s503_s17 = spop %502 }
  0x95   : > { %v217_v19 = vmul.f32 %v475_v9, %v216_v17  ;;  %v218_v20 = vmul.f32 %v476_v10, %v216_v17  ;;  %v224_v21 = vstv %s503_s17 }
  0x96   : > { %v225_v22 = vmul.f32 %v477_v12, %v224_v21  ;;  %v226_v23 = vmul.f32 %v478_v13, %v224_v21 }
  0x97   : > { %v219_v24 = vmin.f32 %v211_v15, %v217_v19  ;;  %v220_v25 = vmin.f32 %v212_v16, %v218_v20 }
  0x99   : > { %v227_v27 = vmin.f32 %v219_v24, %v225_v22  ;;  %v228_v28 = vmin.f32 %v220_v25, %v226_v23 }
  0x9b   : > { %v240_v29 = vsel %vm237_vm0, %v227_v27, inf  ;;  %v241_v30 = vsel %vm237_vm0, %v228_v28, inf }
  0x9c   : > { %v242_v31 = vrot.slane %v240_v29, 7  ;;  %v243_v32 = vrot.slane %v241_v30, 7  ;;  %v247_v33 = vrot.slane %v240_v29, 1  ;;  %v248_v34 = vrot.slane %v241_v30, 1 }
  0x9e   : > { %v245_v35 = vsel %vm244_vm1, %v242_v31, %v243_v32  ;;  %v246_v36 = vsel %vm244_vm1, %v243_v32, %v242_v31  ;;  %v251_v37 = vsel %vm249_vm2, %v248_v34, %v247_v33  ;;  %v250_v42 = vsel %vm249_vm2, %v247_v33, %v248_v34 }
  0x9f   : > { %v258_v38 = vsel %vm252_vm3, %v246_v36, inf  ;;  %v267_v39 = vsel %vm261_vm4, %v251_v37, inf  ;;  %v269_v40 = vmin.f32 %v241_v30, %v245_v35 }
  0xa0   : > { %v268_v41 = vmin.f32 %v240_v29, %v258_v38 }
  0xa1   : > { %v271_v43 = vmin.f32 %v269_v40, %v267_v39 }
  0xa2   : > { %v270_v44 = vmin.f32 %v268_v41, %v250_v42 }
  0xa3   : > { %273 = vst [vmem:[%s920_s15 + $0x8] sm:$0xff] %v271_v43  ;;  %v275_v45 = vrot.slane %v271_v43, 6  ;;  %v280_v46 = vrot.slane %v271_v43, 2 }
  0xa4   : > { %272 = vst [vmem:[%s920_s15] sm:$0xff] %v270_v44  ;;  %v274_v47 = vrot.slane %v270_v44, 6  ;;  %v279_v48 = vrot.slane %v270_v44, 2 }
  0xa6   : > { %v277_v49 = vsel %vm276_vm5, %v274_v47, %v275_v45  ;;  %v278_v50 = vsel %vm276_vm5, %v275_v45, %v274_v47  ;;  %v283_v51 = vsel %vm281_vm6, %v280_v46, %v279_v48  ;;  %v282_v56 = vsel %vm281_vm6, %v279_v48, %v280_v46 }
  0xa7   : > { %v290_v52 = vsel %vm284_vm7, %v278_v50, inf  ;;  %v299_v53 = vsel %vm293_vm8, %v283_v51, inf  ;;  %v301_v54 = vmin.f32 %v271_v43, %v277_v49 }
  0xa8   : > { %v300_v55 = vmin.f32 %v270_v44, %v290_v52 }
  0xa9   : > { %v303_v57 = vmin.f32 %v301_v54, %v299_v53 }
  0xaa   : > { %v302_v58 = vmin.f32 %v300_v55, %v282_v56 }
  0xab   : > { %480 = vst [vmem:[%s920_s15 + $0x18] sm:$0xff] %v303_v57  ;;  %v308_v59 = vrot.slane %v303_v57, 4 }
  0xac   : > { %479 = vst [vmem:[%s920_s15 + $0x10] sm:$0xff] %v302_v58  ;;  %v307_v60 = vrot.slane %v302_v58, 4 }
  0xae   : > { %v310_v61 = vsel %vm309_vm9, %v307_v60, %v308_v59  ;;  %v311_v62 = vsel %vm309_vm9, %v308_v59, %v307_v60 }
  0xaf   : > { %v318_v63 = vsel %vm312_vm10, %v311_v62, inf  ;;  %v327_v0 = vsel %vm321_vm11, %v311_v62, inf  ;;  %v329_v1 = vmin.f32 %v303_v57, %v310_v61 }
  0xb0   : > { %v328_v2 = vmin.f32 %v302_v58, %v318_v63 }
  0xb1   : > { %v331_v3 = vmin.f32 %v329_v1, %v327_v0 }
  0xb2   : > { %v330_v4 = vmin.f32 %v328_v2, %v310_v61 }
  0xb3   : > { %482 = vst [vmem:[%s920_s15 + $0x28] sm:$0xff] %v331_v3 }
  0xb4   : > { %481 = vst [vmem:[%s920_s15 + $0x20] sm:$0xff] %v330_v4  ;;  %v335_v5 = vmin.f32 %v330_v4, %v331_v3 }
  0xb6   : > { %v336_v6 = vrot.slane %v335_v5, 4 }
  0xb8   : > { %v337_v7 = vmin.f32 %v335_v5, %v336_v6 }
  0xba   : > { %v338_v8 = vrot.slane %v337_v7, 2 }
  0xbc   : > { %v339_v9 = vmin.f32 %v337_v7, %v338_v8 }
  0xbe   : > { %v340_v10 = vrot.slane %v339_v9, 1 }
  0xc0   : > { %v341_v11 = vmin.f32 %v339_v9, %v340_v10 }
  0xc2   : > { %483 = vst [vmem:[%s920_s15 + $0x30] sm:$0xff] %v341_v11  ;;  %484 = vst [vmem:[%s920_s15 + $0x38] sm:$0xff] %v341_v11 }
  0xc3   : > { %485 = vst [vmem:[%s920_s15 + $0x40] sm:$0xff] %v341_v11  ;;  %486 = vst [vmem:[%s920_s15 + $0x48] sm:$0xff] %v341_v11 }
  0xc4   : > { %487 = vst [vmem:[%s920_s15 + $0x50] sm:$0xff] %v341_v11  ;;  %488 = vst [vmem:[%s920_s15 + $0x58] sm:$0xff] %v341_v11 }
  0xc5   : > { %489 = vst [vmem:[%s920_s15 + $0x60] sm:$0xff] %v341_v11  ;;  %490 = vst [vmem:[%s920_s15 + $0x68] sm:$0xff] %v341_v11 }
  0xc6   : > { %646 = shalt.err (!%p643_p9)
}
  0xc7   : > { %s647_s24 = scalar_lea.hbm %s938_s6, 1792  ;;  %s651_s18 = scalar_lea.hbm %s999_s2, 3584 }
  0xc8   : > { %p648_p4 = scmp.ne.s32.totalorder %s938_s6, %s647_s24  ;;  %p652_p5 = scmp.lt.u32.totalorder %s938_s6, %s999_s2 }
  0xc9   : > { %p653_p3 = scmp.lt.u32.totalorder %s651_s18, %s647_s24  ;;  %p655_p12 = scmp.lt.u32.totalorder %s647_s24, %s938_s6 }
  0xca   : > { %p649_p10 = pnand %p648_p4, %p1015_p2 }
  0xcb   : > { %p654_p7 = por %p653_p3, %p652_p5 }
  0xcc   : > { %p650_p11 = pneg %p649_p10 }
  0xcd   : > { %p656_p13 = por %p655_p12, %p654_p7 }
  0xcf   : > { %p657_p6 = pnand %p656_p13, %p650_p11 }
  0xd1   : > { %660 = shalt.err (!%p657_p6)
}
  0xd2   : > { %s726_s3 = smov 128   ;;  %s727_s15 = smov 8  }
  0xd3   : > { %511 = dma.vmem_to_hbm [thread:$0]  (%p1015_p2), %s940_s23, 1792, %s938_s6, %s355_s12, %s726_s3, %s726_s3, %s727_s15  }
  0xd4 PF: > { %s384_s16 = sand.u32 1, %s699_s9   ;;  %p1016_p0 = scmp.ne.s32.totalorder %s1008_s22, 0 }
  0xd5   : > { %p1017_p1 = scmp.ge.s32.totalorder %s719_s14, 2  ;;  %s385_s30 = scalar_lea.sflag [#allocation4], %s384_s16 }
  0xd7   : > { %p522_p8 = pnand %p1017_p1, %p1016_p0 }
  0xd9   : > { %694 = dma.done.wait (!%p522_p8), %s385_s30, 1792  }
  0xda   : > { %696 = vsyncadd (!%p522_p8), %s385_s30, 4294965504  ;;  %s19_s14 = sadd.s32 1, %s719_s14   ;;  %s1018_s9 = smov %s703_s10 }
  0xdb   : > { %p16_p9 = scmp.ge.s32.totalorder %s19_s14, 4   ;;  %s1019_s10 = smov %s707_s11 }
  0xdc   : > { %s1020_s11 = smov %s853_s25  ;;  %s1021_s12 = smov %s715_s13 }
  0xdd   : > { %s1022_s13 = smov %s1024_s29  ;;  %18 = sbr.rel (!%p16_p9) target bundleno = 7 (0x7), region = 86 }
  0xe4   :  { %390 = vsyncpa [#allocation3], 1 }
  0xe5   :  { %392 = vsyncpa [#allocation3 + $0x1], 1 }
  0xe6   :  { %393 = vsyncpa [#allocation4], 1 }
  0xe7   :  { %395 = vsyncpa [#allocation4 + $0x1], 1 }
  0xe8   :  { %396 = vsyncpa [#allocation5], 1 }
  0xe9   :  { %398 = vsyncpa [#allocation5 + $0x1], 1 }

</bundles_post_ra>
